<compile_context>
chip_gen: v6e
topology: v6e:2x2x1
jax: 0.10.0
libtpu: 0.0.40
codegen_flags: <defaults>
</compile_context>

<pallas_src>
import functools

import jax
import jax.numpy as jnp
from jax import lax
from jax.experimental import pallas as pl
from jax.experimental.pallas import tpu as pltpu

INPUT_SIZE = 10
OUTPUT_SIZE = 1
RESERVOIR_SIZE = 100


def esn_kernel(x_ref, w_ref, w_read_ref, out_ref):
    """x_ref: (T, Bp, K)  w_ref: (K, K)  w_read_ref: (K, N)  out_ref: (Bp, N).

    x_ref[t] lanes: [0,I)=x_t, lane I+R = 1.0 (bias lane), rest 0.
    w_ref rows: [0,I)=W_in^T, [I,I+R)=W_res^T, row I+R = b_in+b_res,
    all targeting columns [I, I+R); other columns zero.
    """
    T, Bp, K = x_ref.shape

    w = w_ref[...]                                   # (K, K), loaded once

    def step(t, a):
        # `a` is the previous activation: only lanes [I, I+R) are nonzero
        # (the reservoir); x_ref[t] re-injects x_t and the constant-1 bias
        # lane, so one VPU add assembles the fused carry
        #   z = [x_t | reservoir | 1 | 0...]
        z = a + x_ref[t]
        # Single fused MXU pass; bias is folded in via the ones-lane row.
        return jnp.tanh(jnp.dot(z, w, preferred_element_type=jnp.float32))

    a0 = jnp.zeros((Bp, K), jnp.float32)
    # T is small & static -> full unroll is fine; cap (e.g. unroll=8) for big T.
    a_final = lax.fori_loop(0, T, step, a0, unroll=True)

    # Fused O=1 readout: lane-dense (Bp, 128) store, result in column 0.
    out_ref[...] = jnp.dot(a_final, w_read_ref[...],
                           preferred_element_type=jnp.float32)


@functools.partial(jax.jit, static_argnames=())
def esn_forward(x, w_in, b_in, w_res, b_res, w_out, b_out):
    """x: (B, T, I) float32.  Weights in PyTorch nn.Linear convention:
       w_in (R, I), w_res (R, R), w_out (O, R); biases (R,), (R,), (O,)."""
    B, T, I = x.shape
    R = w_in.shape[0]
    O = w_out.shape[0]

    K = 128       # fused contraction width / padded reservoir lane width
    N = 128       # lane-dense readout width (column 0 carries the output)
    # The single-MXU-pass layout needs x_t, the reservoir and one spare
    # bias lane to share a 128-lane tile (I + R = 110 < 128 here).
    assert I + R < K, "fused layout assumes input_size + reservoir_size < 128"
    Bp = ((max(B, 1) + 7) // 8) * 8   # sublane-pad batch to a multiple of 8
    ones_lane = I + R

    f32 = jnp.float32
    # Fused weight: rows = carry lanes ([x | reservoir | 1 | pad]); cols = next
    # reservoir lanes at [I, I+R).  Row `ones_lane` carries the fused bias.
    w_cat = jnp.zeros((K, K), f32)
    w_cat = w_cat.at[0:I, I:I + R].set(w_in.T.astype(f32))
    w_cat = w_cat.at[I:I + R, I:I + R].set(w_res.T.astype(f32))
    w_cat = w_cat.at[ones_lane, I:I + R].set((b_in + b_res).astype(f32))

    # Fused readout weight: w_out^T in rows [I, I+R), column 0; rest zero.
    w_read = jnp.zeros((K, N), f32)
    w_read = w_read.at[I:I + R, 0:O].set(w_out.T.astype(f32))

    # Time-major, batch-padded input slab; x in lanes [0,I), bias lane = 1.
    x_pad = jnp.zeros((T, Bp, K), f32)
    x_pad = x_pad.at[:, :B, 0:I].set(jnp.transpose(x, (1, 0, 2)).astype(f32))
    x_pad = x_pad.at[:, :, ones_lane].set(1.0)

    out_slab = pl.pallas_call(
        esn_kernel,
        out_shape=jax.ShapeDtypeStruct((Bp, N), f32),
        in_specs=[
            pl.BlockSpec(memory_space=pltpu.MemorySpace.VMEM),  # x slab (tiny)
            pl.BlockSpec(memory_space=pltpu.MemorySpace.VMEM),  # fused weights
            pl.BlockSpec(memory_space=pltpu.MemorySpace.VMEM),  # readout weight
        ],
        out_specs=pl.BlockSpec(memory_space=pltpu.MemorySpace.VMEM),
    )(x_pad, w_cat, w_read)
    # TODO(synk): for long sequences, switch to a time-chunked grid
    # (grid=(ceil(T/Tc),), time axis "arbitrary", state in VMEM scratch) so
    # the x slab stays double-buffered and within v7x's 64 MiB VMEM.

    # O=1 bias add + un-pad; fused by jit into the same XLA computation.
    return out_slab[:B, :O] + b_out.astype(f32)


def esn_reference(x, w_in, b_in, w_res, b_res, w_out, b_out):
    B, T, _ = x.shape
    R = w_in.shape[0]
    reservoir = jnp.zeros((B, R), jnp.float32)
    for t in range(T):
        x_t = x[:, t, :]
        reservoir = jnp.tanh(x_t @ w_in.T + b_in + reservoir @ w_res.T + b_res)
    return reservoir @ w_out.T + b_out


if __name__ == "__main__":
    B, T = 2, 8
    I, R, O = INPUT_SIZE, RESERVOIR_SIZE, OUTPUT_SIZE

    key = jax.random.PRNGKey(0)
    ks = jax.random.split(key, 7)
    x = jax.random.normal(ks[0], (B, T, I), jnp.float32)

    # Deterministic parameter init (PyTorch Linear shapes: weight (out, in)).
    w_in = jax.random.uniform(ks[1], (R, I), jnp.float32, -0.3, 0.3)
    b_in = jax.random.uniform(ks[2], (R,), jnp.float32, -0.3, 0.3)
    w_res = jax.random.uniform(ks[3], (R, R), jnp.float32, -0.1, 0.1)
    b_res = jax.random.uniform(ks[4], (R,), jnp.float32, -0.1, 0.1)
    w_out = jax.random.uniform(ks[5], (O, R), jnp.float32, -0.1, 0.1)
    b_out = jax.random.uniform(ks[6], (O,), jnp.float32, -0.1, 0.1)

    out = esn_forward(x, w_in, b_in, w_res, b_res, w_out, b_out)
    out = jax.block_until_ready(out)

    ref = esn_reference(x, w_in, b_in, w_res, b_res, w_out, b_out)
    assert out.shape == (B, O)
    assert jnp.allclose(out, ref, atol=1e-4, rtol=1e-4)

    print("KERNEL_OK")
</pallas_src>

<mosaic_0001>
module attributes {stable_mosaic.version = 11 : i64} {
  func.func @esn_kernel(%arg0: memref<8x8x128xf32, #tpu.memory_space<vmem>>, %arg1: memref<128x128xf32, #tpu.memory_space<vmem>>, %arg2: memref<128x128xf32, #tpu.memory_space<vmem>>, %arg3: memref<8x128xf32, #tpu.memory_space<vmem>>) attributes {dimension_semantics = [], scalar_prefetch = 0 : i64, scratch_operands = 0 : i64, tpu.core_type = #tpu.core_type<tc>} {
    %c0 = arith.constant 0 : index
    %c0_0 = arith.constant 0 : index
    %0 = vector.load %arg1[%c0, %c0_0] : memref<128x128xf32, #tpu.memory_space<vmem>>, vector<128x128xf32>
    %cst = arith.constant 0.000000e+00 : f32
    %1 = vector.broadcast %cst : f32 to vector<8x128xf32>
    %c0_i32 = arith.constant 0 : i32
    %2 = arith.index_cast %c0_i32 : i32 to index
    %c0_1 = arith.constant 0 : index
    %c0_2 = arith.constant 0 : index
    %3 = vector.load %arg0[%2, %c0_1, %c0_2] : memref<8x8x128xf32, #tpu.memory_space<vmem>>, vector<1x8x128xf32>
    %4 = vector.shape_cast %3 : vector<1x8x128xf32> to vector<8x128xf32>
    %5 = arith.addf %1, %4 : vector<8x128xf32>
    %cst_3 = arith.constant dense<0.000000e+00> : vector<8x128xf32>
    %6 = tpu.matmul %5, %0, %cst_3 {dimension_numbers = #tpu.dot_dimension_numbers<[1], [0], [0], [1], [0, 0, 1, 1], [], []>} : vector<8x128xf32>, vector<128x128xf32>, vector<8x128xf32> -> vector<8x128xf32>
    %7 = math.tanh %6 : vector<8x128xf32>
    %c1_i32 = arith.constant 1 : i32
    %8 = arith.index_cast %c1_i32 : i32 to index
    %c0_4 = arith.constant 0 : index
    %c0_5 = arith.constant 0 : index
    %9 = vector.load %arg0[%8, %c0_4, %c0_5] : memref<8x8x128xf32, #tpu.memory_space<vmem>>, vector<1x8x128xf32>
    %10 = vector.shape_cast %9 : vector<1x8x128xf32> to vector<8x128xf32>
    %11 = arith.addf %7, %10 : vector<8x128xf32>
    %cst_6 = arith.constant dense<0.000000e+00> : vector<8x128xf32>
    %12 = tpu.matmul %11, %0, %cst_6 {dimension_numbers = #tpu.dot_dimension_numbers<[1], [0], [0], [1], [0, 0, 1, 1], [], []>} : vector<8x128xf32>, vector<128x128xf32>, vector<8x128xf32> -> vector<8x128xf32>
    %13 = math.tanh %12 : vector<8x128xf32>
    %c2_i32 = arith.constant 2 : i32
    %14 = arith.index_cast %c2_i32 : i32 to index
    %c0_7 = arith.constant 0 : index
    %c0_8 = arith.constant 0 : index
    %15 = vector.load %arg0[%14, %c0_7, %c0_8] : memref<8x8x128xf32, #tpu.memory_space<vmem>>, vector<1x8x128xf32>
    %16 = vector.shape_cast %15 : vector<1x8x128xf32> to vector<8x128xf32>
    %17 = arith.addf %13, %16 : vector<8x128xf32>
    %cst_9 = arith.constant dense<0.000000e+00> : vector<8x128xf32>
    %18 = tpu.matmul %17, %0, %cst_9 {dimension_numbers = #tpu.dot_dimension_numbers<[1], [0], [0], [1], [0, 0, 1, 1], [], []>} : vector<8x128xf32>, vector<128x128xf32>, vector<8x128xf32> -> vector<8x128xf32>
    %19 = math.tanh %18 : vector<8x128xf32>
    %c3_i32 = arith.constant 3 : i32
    %20 = arith.index_cast %c3_i32 : i32 to index
    %c0_10 = arith.constant 0 : index
    %c0_11 = arith.constant 0 : index
    %21 = vector.load %arg0[%20, %c0_10, %c0_11] : memref<8x8x128xf32, #tpu.memory_space<vmem>>, vector<1x8x128xf32>
    %22 = vector.shape_cast %21 : vector<1x8x128xf32> to vector<8x128xf32>
    %23 = arith.addf %19, %22 : vector<8x128xf32>
    %cst_12 = arith.constant dense<0.000000e+00> : vector<8x128xf32>
    %24 = tpu.matmul %23, %0, %cst_12 {dimension_numbers = #tpu.dot_dimension_numbers<[1], [0], [0], [1], [0, 0, 1, 1], [], []>} : vector<8x128xf32>, vector<128x128xf32>, vector<8x128xf32> -> vector<8x128xf32>
    %25 = math.tanh %24 : vector<8x128xf32>
    %c4_i32 = arith.constant 4 : i32
    %26 = arith.index_cast %c4_i32 : i32 to index
    %c0_13 = arith.constant 0 : index
    %c0_14 = arith.constant 0 : index
    %27 = vector.load %arg0[%26, %c0_13, %c0_14] : memref<8x8x128xf32, #tpu.memory_space<vmem>>, vector<1x8x128xf32>
    %28 = vector.shape_cast %27 : vector<1x8x128xf32> to vector<8x128xf32>
    %29 = arith.addf %25, %28 : vector<8x128xf32>
    %cst_15 = arith.constant dense<0.000000e+00> : vector<8x128xf32>
    %30 = tpu.matmul %29, %0, %cst_15 {dimension_numbers = #tpu.dot_dimension_numbers<[1], [0], [0], [1], [0, 0, 1, 1], [], []>} : vector<8x128xf32>, vector<128x128xf32>, vector<8x128xf32> -> vector<8x128xf32>
    %31 = math.tanh %30 : vector<8x128xf32>
    %c5_i32 = arith.constant 5 : i32
    %32 = arith.index_cast %c5_i32 : i32 to index
    %c0_16 = arith.constant 0 : index
    %c0_17 = arith.constant 0 : index
    %33 = vector.load %arg0[%32, %c0_16, %c0_17] : memref<8x8x128xf32, #tpu.memory_space<vmem>>, vector<1x8x128xf32>
    %34 = vector.shape_cast %33 : vector<1x8x128xf32> to vector<8x128xf32>
    %35 = arith.addf %31, %34 : vector<8x128xf32>
    %cst_18 = arith.constant dense<0.000000e+00> : vector<8x128xf32>
    %36 = tpu.matmul %35, %0, %cst_18 {dimension_numbers = #tpu.dot_dimension_numbers<[1], [0], [0], [1], [0, 0, 1, 1], [], []>} : vector<8x128xf32>, vector<128x128xf32>, vector<8x128xf32> -> vector<8x128xf32>
    %37 = math.tanh %36 : vector<8x128xf32>
    %c6_i32 = arith.constant 6 : i32
    %38 = arith.index_cast %c6_i32 : i32 to index
    %c0_19 = arith.constant 0 : index
    %c0_20 = arith.constant 0 : index
    %39 = vector.load %arg0[%38, %c0_19, %c0_20] : memref<8x8x128xf32, #tpu.memory_space<vmem>>, vector<1x8x128xf32>
    %40 = vector.shape_cast %39 : vector<1x8x128xf32> to vector<8x128xf32>
    %41 = arith.addf %37, %40 : vector<8x128xf32>
    %cst_21 = arith.constant dense<0.000000e+00> : vector<8x128xf32>
    %42 = tpu.matmul %41, %0, %cst_21 {dimension_numbers = #tpu.dot_dimension_numbers<[1], [0], [0], [1], [0, 0, 1, 1], [], []>} : vector<8x128xf32>, vector<128x128xf32>, vector<8x128xf32> -> vector<8x128xf32>
    %43 = math.tanh %42 : vector<8x128xf32>
    %c7_i32 = arith.constant 7 : i32
    %44 = arith.index_cast %c7_i32 : i32 to index
    %c0_22 = arith.constant 0 : index
    %c0_23 = arith.constant 0 : index
    %45 = vector.load %arg0[%44, %c0_22, %c0_23] : memref<8x8x128xf32, #tpu.memory_space<vmem>>, vector<1x8x128xf32>
    %46 = vector.shape_cast %45 : vector<1x8x128xf32> to vector<8x128xf32>
    %47 = arith.addf %43, %46 : vector<8x128xf32>
    %cst_24 = arith.constant dense<0.000000e+00> : vector<8x128xf32>
    %48 = tpu.matmul %47, %0, %cst_24 {dimension_numbers = #tpu.dot_dimension_numbers<[1], [0], [0], [1], [0, 0, 1, 1], [], []>} : vector<8x128xf32>, vector<128x128xf32>, vector<8x128xf32> -> vector<8x128xf32>
    %49 = math.tanh %48 : vector<8x128xf32>
    %c8_i32 = arith.constant 8 : i32
    %c0_25 = arith.constant 0 : index
    %c0_26 = arith.constant 0 : index
    %50 = vector.load %arg2[%c0_25, %c0_26] : memref<128x128xf32, #tpu.memory_space<vmem>>, vector<128x128xf32>
    %cst_27 = arith.constant dense<0.000000e+00> : vector<8x128xf32>
    %51 = tpu.matmul %49, %50, %cst_27 {dimension_numbers = #tpu.dot_dimension_numbers<[1], [0], [0], [1], [0, 0, 1, 1], [], []>} : vector<8x128xf32>, vector<128x128xf32>, vector<8x128xf32> -> vector<8x128xf32>
    %c0_28 = arith.constant 0 : index
    %c0_29 = arith.constant 0 : index
    %52 = vector.load %arg3[%c0_28, %c0_29] : memref<8x128xf32, #tpu.memory_space<vmem>>, vector<8x128xf32>
    tpu.vector_store %arg3[%c0_28, %c0_29], %51 {strides = array<i32>} : memref<8x128xf32, #tpu.memory_space<vmem>>, vector<8x128xf32>,
    return
  }
}

</mosaic_0001>

<bundles_post_ra>
// kernel: esn_forward.1
= control target key start
LH: loop header
LB: loop body
LE: loop exit
PB: predicated region body
PF: predicated region fallthrough
CT: control target
= control target key end

     0   :  { %v1205_v0 = vmov 0.0   ;;  %vm1206_vm0 = vmmov 0   ;;  %s1672_s1 = inlined_call_operand.vmem [shape: f32[128,128], index: 1, kind: input, shape index: {}]   ;;  %s1673_s0 = inlined_call_operand.vmem [shape: f32[8,8,128], index: 0, kind: input, shape index: {}]   ;;  %s1674_s2 = inlined_call_operand.vmem [shape: f32[128,128], index: 2, kind: input, shape index: {}]   ;;  %s1675_s3 = inlined_call_operand.vmem [shape: f32[8,128], index: 3, kind: output, shape index: {}]  }
   0x1   :  { %872 = vmatprep.subr.mxu0 %v1205_v0  ;;  %v1231_v1 = vld [vmem:[%s1672_s1 + $0x78] sm:$0xff]  ;;  %v1236_v2 = vld [vmem:[%s1672_s1 + $0x70] sm:$0xff]  ;;  %904 = vmatprep.mubr.msk.f32.mxu0 %vm1206_vm0, %v1205_v0  ;;  %v1246_v3 = vld [vmem:[%s1672_s1 + $0x68] sm:$0xff] }
   0x2   :  { %873 = vmatpush3.msra.mxu0 %v1231_v1  ;;  %907 = vmatprep.subr.mxu1 %v1205_v0  ;;  %v1255_v4 = vld [vmem:[%s1672_s1 + $0x60] sm:$0xff]  ;;  %v1264_v5 = vld [vmem:[%s1672_s1 + $0x58] sm:$0xff]  ;;  %v1273_v6 = vld [vmem:[%s1672_s1 + $0x50] sm:$0xff] }
   0x3   :  { %874 = vmatprep.subr.mxu0 %v1205_v0  ;;  %908 = vmatpush3.msra.mxu1 %v1231_v1  ;;  %v1282_v7 = vld [vmem:[%s1672_s1 + $0x48] sm:$0xff]  ;;  %v1291_v8 = vld [vmem:[%s1672_s1 + $0x40] sm:$0xff]  ;;  %v1300_v9 = vld [vmem:[%s1672_s1 + $0x38] sm:$0xff] }
   0x4   :  { %875 = vmatpush3.msra.mxu0 %v1236_v2  ;;  %909 = vmatprep.subr.mxu1 %v1205_v0  ;;  %v1309_v10 = vld [vmem:[%s1672_s1 + $0x30] sm:$0xff]  ;;  %v1318_v11 = vld [vmem:[%s1672_s1 + $0x28] sm:$0xff]  ;;  %v1327_v12 = vld [vmem:[%s1672_s1 + $0x20] sm:$0xff] }
   0x5   :  { %876 = vmatprep.subr.mxu0 %v1205_v0  ;;  %910 = vmatpush3.msra.mxu1 %v1236_v2  ;;  %v1336_v13 = vld [vmem:[%s1672_s1 + $0x18] sm:$0xff]  ;;  %v1345_v14 = vld [vmem:[%s1672_s1 + $0x10] sm:$0xff]  ;;  %v1354_v15 = vld [vmem:[%s1672_s1 + $0x8] sm:$0xff] }
   0x6   :  { %877 = vmatpush3.msra.mxu0 %v1246_v3  ;;  %911 = vmatprep.subr.mxu1 %v1205_v0  ;;  %v1363_v16 = vld [vmem:[%s1672_s1] sm:$0xff]  ;;  %v712_v20 = vld [vmem:[%s1673_s0 + $0x8] sm:$0xff]  ;;  %v713_v25 = vld [vmem:[%s1673_s0 + $0x10] sm:$0xff] }
   0x7   :  { %878 = vmatprep.subr.mxu0 %v1205_v0  ;;  %912 = vmatpush3.msra.mxu1 %v1246_v3  ;;  %v30_v17 = vld [vmem:[%s1673_s0] sm:$0xff]  ;;  %v714_v30 = vld [vmem:[%s1673_s0 + $0x18] sm:$0xff]  ;;  %v716_v40 = vld [vmem:[%s1673_s0 + $0x28] sm:$0xff] }
   0x8   :  { %879 = vmatpush3.msra.mxu0 %v1255_v4  ;;  %913 = vmatprep.subr.mxu1 %v1205_v0  ;;  %v715_v35 = vld [vmem:[%s1673_s0 + $0x20] sm:$0xff]  ;;  %v717_v45 = vld [vmem:[%s1673_s0 + $0x30] sm:$0xff]  ;;  %v636_v48 = vld [vmem:[%s1674_s2 + $0x78] sm:$0xff] }
   0x9   :  { %880 = vmatprep.subr.mxu0 %v1205_v0  ;;  %914 = vmatpush3.msra.mxu1 %v1255_v4  ;;  %v635_v49 = vld [vmem:[%s1674_s2 + $0x70] sm:$0xff]  ;;  %v634_v50 = vld [vmem:[%s1674_s2 + $0x68] sm:$0xff]  ;;  %v633_v51 = vld [vmem:[%s1674_s2 + $0x60] sm:$0xff] }
   0xa   :  { %881 = vmatpush3.msra.mxu0 %v1264_v5  ;;  %915 = vmatprep.subr.mxu1 %v1205_v0  ;;  %v632_v52 = vld [vmem:[%s1674_s2 + $0x58] sm:$0xff]  ;;  %v631_v53 = vld [vmem:[%s1674_s2 + $0x50] sm:$0xff]  ;;  %v630_v54 = vld [vmem:[%s1674_s2 + $0x48] sm:$0xff] }
   0xb   :  { %882 = vmatprep.subr.mxu0 %v1205_v0  ;;  %916 = vmatpush3.msra.mxu1 %v1264_v5  ;;  %v629_v55 = vld [vmem:[%s1674_s2 + $0x40] sm:$0xff]  ;;  %v718_v58 = vld [vmem:[%s1673_s0 + $0x38] sm:$0xff]  ;;  %v627_v62 = vld [vmem:[%s1674_s2 + $0x30] sm:$0xff] }
   0xc   :  { %883 = vmatpush3.msra.mxu0 %v1273_v6  ;;  %917 = vmatprep.subr.mxu1 %v1205_v0  ;;  %v628_v61 = vld [vmem:[%s1674_s2 + $0x38] sm:$0xff]  ;;  %v626_v63 = vld [vmem:[%s1674_s2 + $0x28] sm:$0xff] }
   0xd   :  { %884 = vmatprep.subr.mxu0 %v1205_v0  ;;  %918 = vmatpush3.msra.mxu1 %v1273_v6 }
   0xe   :  { %885 = vmatpush3.msra.mxu0 %v1282_v7  ;;  %919 = vmatprep.subr.mxu1 %v1205_v0 }
   0xf   :  { %886 = vmatprep.subr.mxu0 %v1205_v0  ;;  %920 = vmatpush3.msra.mxu1 %v1282_v7 }
  0x10   :  { %887 = vmatpush3.msra.mxu0 %v1291_v8  ;;  %921 = vmatprep.subr.mxu1 %v1205_v0 }
  0x11   :  { %888 = vmatprep.subr.mxu0 %v1205_v0  ;;  %922 = vmatpush3.msra.mxu1 %v1291_v8 }
  0x12   :  { %889 = vmatpush3.msra.mxu0 %v1300_v9  ;;  %923 = vmatprep.subr.mxu1 %v1205_v0 }
  0x13   :  { %890 = vmatprep.subr.mxu0 %v1205_v0  ;;  %924 = vmatpush3.msra.mxu1 %v1300_v9 }
  0x14   :  { %891 = vmatpush3.msra.mxu0 %v1309_v10  ;;  %925 = vmatprep.subr.mxu1 %v1205_v0 }
  0x15   :  { %892 = vmatprep.subr.mxu0 %v1205_v0  ;;  %926 = vmatpush3.msra.mxu1 %v1309_v10 }
  0x16   :  { %893 = vmatpush3.msra.mxu0 %v1318_v11  ;;  %927 = vmatprep.subr.mxu1 %v1205_v0 }
  0x17   :  { %894 = vmatprep.subr.mxu0 %v1205_v0  ;;  %928 = vmatpush3.msra.mxu1 %v1318_v11 }
  0x18   :  { %895 = vmatpush3.msra.mxu0 %v1327_v12  ;;  %929 = vmatprep.subr.mxu1 %v1205_v0 }
  0x19   :  { %896 = vmatprep.subr.mxu0 %v1205_v0  ;;  %930 = vmatpush3.msra.mxu1 %v1327_v12 }
  0x1a   :  { %897 = vmatpush3.msra.mxu0 %v1336_v13  ;;  %931 = vmatprep.subr.mxu1 %v1205_v0 }
  0x1b   :  { %898 = vmatprep.subr.mxu0 %v1205_v0  ;;  %932 = vmatpush3.msra.mxu1 %v1336_v13 }
  0x1c   :  { %899 = vmatpush3.msra.mxu0 %v1345_v14  ;;  %933 = vmatprep.subr.mxu1 %v1205_v0 }
  0x1d   :  { %900 = vmatprep.subr.mxu0 %v1205_v0  ;;  %934 = vmatpush3.msra.mxu1 %v1345_v14 }
  0x1e   :  { %901 = vmatpush3.msra.mxu0 %v1354_v15  ;;  %935 = vmatprep.subr.mxu1 %v1205_v0 }
  0x1f   :  { %902 = vmatprep.subr.mxu0 %v1205_v0  ;;  %936 = vmatpush3.msra.mxu1 %v1354_v15 }
  0x20   :  { %903 = vmatpush3.msra.mxu0 %v1363_v16  ;;  %937 = vmatprep.subr.mxu1 %v1205_v0 }
  0x21   :  { %905 = vmatmul.mubr.f32.vlgmr.msra.gmra.mxu0 %v30_v17  ;;  %938 = vmatpush3.msra.mxu1 %v1363_v16 }
  0x22   :  { %939 = vmatprep.mubr.msk.f32.mxu1 %vm1206_vm0, %v1205_v0  ;;  %942 = vmatprep.subr.mxu0 %v1205_v0 }
  0x23   :  { %943 = vmatpush3.msra.mxu0 %v1231_v1  ;;  %974 = vmatprep.mubr.msk.f32.mxu0 %vm1206_vm0, %v1205_v0 }
  0x24   :  { %944 = vmatprep.subr.mxu0 %v1205_v0  ;;  %977 = vmatprep.subr.mxu1 %v1205_v0 }
  0x25   :  { %945 = vmatpush3.msra.mxu0 %v1236_v2 }
  0x26   :  { %946 = vmatprep.subr.mxu0 %v1205_v0 }
  0x27   :  { %947 = vmatpush3.msra.mxu0 %v1246_v3 }
  0x28   :  { %948 = vmatprep.subr.mxu0 %v1205_v0 }
  0x29   :  { %949 = vmatpush3.msra.mxu0 %v1255_v4 }
  0x2a   :  { %950 = vmatprep.subr.mxu0 %v1205_v0 }
  0x2b   :  { %951 = vmatpush3.msra.mxu0 %v1264_v5 }
  0x2c   :  { %952 = vmatprep.subr.mxu0 %v1205_v0 }
  0x2d   :  { %953 = vmatpush3.msra.mxu0 %v1273_v6 }
  0x2e   :  { %954 = vmatprep.subr.mxu0 %v1205_v0 }
  0x2f   :  { %955 = vmatpush3.msra.mxu0 %v1282_v7 }
  0x30   :  { %956 = vmatprep.subr.mxu0 %v1205_v0 }
  0x31   :  { %957 = vmatpush3.msra.mxu0 %v1291_v8 }
  0x32   :  { %958 = vmatprep.subr.mxu0 %v1205_v0 }
  0x33   :  { %959 = vmatpush3.msra.mxu0 %v1300_v9 }
  0x34   :  { %960 = vmatprep.subr.mxu0 %v1205_v0 }
  0x35   :  { %961 = vmatpush3.msra.mxu0 %v1309_v10 }
  0x36   :  { %962 = vmatprep.subr.mxu0 %v1205_v0 }
  0x37   :  { %963 = vmatpush3.msra.mxu0 %v1318_v11 }
  0x38   :  { %964 = vmatprep.subr.mxu0 %v1205_v0 }
  0x39   :  { %965 = vmatpush3.msra.mxu0 %v1327_v12 }
  0x3a   :  { %966 = vmatprep.subr.mxu0 %v1205_v0 }
  0x3b   :  { %967 = vmatpush3.msra.mxu0 %v1336_v13 }
  0x3c   :  { %968 = vmatprep.subr.mxu0 %v1205_v0 }
  0x3d   :  { %969 = vmatpush3.msra.mxu0 %v1345_v14 }
  0x3e   :  { %970 = vmatprep.subr.mxu0 %v1205_v0 }
  0x3f   :  { %971 = vmatpush3.msra.mxu0 %v1354_v15 }
  0x40   :  { %972 = vmatprep.subr.mxu0 %v1205_v0 }
  0x41   :  { %973 = vmatpush3.msra.mxu0 %v1363_v16 }
  0x42   :  { %1012 = vmatprep.subr.mxu0 %v1205_v0 }
  0xe1   :  { %v98_v18 = vpop.f32.mrf.mxu0 }
  0xe2   :  { %1189 = vtanh.f32 %v98_v18 }
  0xe3   :  { %v906_v19 = vpop.f32.mrf.mxu0 }
  0xef   :  { %v1190_v21 = vpop.eup %1189 }
  0xf0   :  { %v105_v22 = vadd.f32 %v1190_v21, %v712_v20 }
  0xf2   :  { %940 = vmatmul.mubr.f32.vlgmr.msra.gmra.mxu1 %v105_v22 }
  0xf3   :  { %978 = vmatpush3.msra.mxu1 %v1231_v1  ;;  %1009 = vmatprep.mubr.msk.f32.mxu1 %vm1206_vm0, %v1205_v0 }
  0xf4   :  { %979 = vmatprep.subr.mxu1 %v1205_v0 }
  0xf5   :  { %980 = vmatpush3.msra.mxu1 %v1236_v2 }
  0xf6   :  { %981 = vmatprep.subr.mxu1 %v1205_v0 }
  0xf7   :  { %982 = vmatpush3.msra.mxu1 %v1246_v3 }
  0xf8   :  { %983 = vmatprep.subr.mxu1 %v1205_v0 }
  0xf9   :  { %984 = vmatpush3.msra.mxu1 %v1255_v4 }
  0xfa   :  { %985 = vmatprep.subr.mxu1 %v1205_v0 }
  0xfb   :  { %986 = vmatpush3.msra.mxu1 %v1264_v5 }
  0xfc   :  { %987 = vmatprep.subr.mxu1 %v1205_v0 }
  0xfd   :  { %988 = vmatpush3.msra.mxu1 %v1273_v6 }
  0xfe   :  { %989 = vmatprep.subr.mxu1 %v1205_v0 }
  0xff   :  { %990 = vmatpush3.msra.mxu1 %v1282_v7 }
 0x100   :  { %991 = vmatprep.subr.mxu1 %v1205_v0 }
 0x101   :  { %992 = vmatpush3.msra.mxu1 %v1291_v8 }
 0x102   :  { %993 = vmatprep.subr.mxu1 %v1205_v0 }
 0x103   :  { %994 = vmatpush3.msra.mxu1 %v1300_v9 }
 0x104   :  { %995 = vmatprep.subr.mxu1 %v1205_v0 }
 0x105   :  { %996 = vmatpush3.msra.mxu1 %v1309_v10 }
 0x106   :  { %997 = vmatprep.subr.mxu1 %v1205_v0 }
 0x107   :  { %998 = vmatpush3.msra.mxu1 %v1318_v11 }
 0x108   :  { %999 = vmatprep.subr.mxu1 %v1205_v0 }
 0x109   :  { %1000 = vmatpush3.msra.mxu1 %v1327_v12 }
 0x10a   :  { %1001 = vmatprep.subr.mxu1 %v1205_v0 }
 0x10b   :  { %1002 = vmatpush3.msra.mxu1 %v1336_v13 }
 0x10c   :  { %1003 = vmatprep.subr.mxu1 %v1205_v0 }
 0x10d   :  { %1004 = vmatpush3.msra.mxu1 %v1345_v14 }
 0x10e   :  { %1005 = vmatprep.subr.mxu1 %v1205_v0 }
 0x10f   :  { %1006 = vmatpush3.msra.mxu1 %v1354_v15 }
 0x110   :  { %1007 = vmatprep.subr.mxu1 %v1205_v0 }
 0x111   :  { %1008 = vmatpush3.msra.mxu1 %v1363_v16 }
 0x112   :  { %1047 = vmatprep.subr.mxu1 %v1205_v0 }
 0x1b2   :  { %v172_v23 = vpop.f32.mrf.mxu1 }
 0x1b3   :  { %1191 = vtanh.f32 %v172_v23 }
 0x1b4   :  { %v941_v24 = vpop.f32.mrf.mxu1 }
 0x1c0   :  { %v1192_v26 = vpop.eup %1191 }
 0x1c1   :  { %v179_v27 = vadd.f32 %v1192_v26, %v713_v25 }
 0x1c3   :  { %975 = vmatmul.mubr.f32.vlgmr.msra.gmra.mxu0 %v179_v27 }
 0x1c4   :  { %1013 = vmatpush3.msra.mxu0 %v1231_v1  ;;  %1044 = vmatprep.mubr.msk.f32.mxu0 %vm1206_vm0, %v1205_v0 }
 0x1c5   :  { %1014 = vmatprep.subr.mxu0 %v1205_v0 }
 0x1c6   :  { %1015 = vmatpush3.msra.mxu0 %v1236_v2 }
 0x1c7   :  { %1016 = vmatprep.subr.mxu0 %v1205_v0 }
 0x1c8   :  { %1017 = vmatpush3.msra.mxu0 %v1246_v3 }
 0x1c9   :  { %1018 = vmatprep.subr.mxu0 %v1205_v0 }
 0x1ca   :  { %1019 = vmatpush3.msra.mxu0 %v1255_v4 }
 0x1cb   :  { %1020 = vmatprep.subr.mxu0 %v1205_v0 }
 0x1cc   :  { %1021 = vmatpush3.msra.mxu0 %v1264_v5 }
 0x1cd   :  { %1022 = vmatprep.subr.mxu0 %v1205_v0 }
 0x1ce   :  { %1023 = vmatpush3.msra.mxu0 %v1273_v6 }
 0x1cf   :  { %1024 = vmatprep.subr.mxu0 %v1205_v0 }
 0x1d0   :  { %1025 = vmatpush3.msra.mxu0 %v1282_v7 }
 0x1d1   :  { %1026 = vmatprep.subr.mxu0 %v1205_v0 }
 0x1d2   :  { %1027 = vmatpush3.msra.mxu0 %v1291_v8 }
 0x1d3   :  { %1028 = vmatprep.subr.mxu0 %v1205_v0 }
 0x1d4   :  { %1029 = vmatpush3.msra.mxu0 %v1300_v9 }
 0x1d5   :  { %1030 = vmatprep.subr.mxu0 %v1205_v0 }
 0x1d6   :  { %1031 = vmatpush3.msra.mxu0 %v1309_v10 }
 0x1d7   :  { %1032 = vmatprep.subr.mxu0 %v1205_v0 }
 0x1d8   :  { %1033 = vmatpush3.msra.mxu0 %v1318_v11 }
 0x1d9   :  { %1034 = vmatprep.subr.mxu0 %v1205_v0 }
 0x1da   :  { %1035 = vmatpush3.msra.mxu0 %v1327_v12 }
 0x1db   :  { %1036 = vmatprep.subr.mxu0 %v1205_v0 }
 0x1dc   :  { %1037 = vmatpush3.msra.mxu0 %v1336_v13 }
 0x1dd   :  { %1038 = vmatprep.subr.mxu0 %v1205_v0 }
 0x1de   :  { %1039 = vmatpush3.msra.mxu0 %v1345_v14 }
 0x1df   :  { %1040 = vmatprep.subr.mxu0 %v1205_v0 }
 0x1e0   :  { %1041 = vmatpush3.msra.mxu0 %v1354_v15 }
 0x1e1   :  { %1042 = vmatprep.subr.mxu0 %v1205_v0 }
 0x1e2   :  { %1043 = vmatpush3.msra.mxu0 %v1363_v16 }
 0x1e3   :  { %1082 = vmatprep.subr.mxu0 %v1205_v0 }
 0x283   :  { %v246_v28 = vpop.f32.mrf.mxu0 }
 0x284   :  { %1193 = vtanh.f32 %v246_v28 }
 0x285   :  { %v976_v29 = vpop.f32.mrf.mxu0 }
 0x291   :  { %v1194_v31 = vpop.eup %1193 }
 0x292   :  { %v253_v32 = vadd.f32 %v1194_v31, %v714_v30 }
 0x294   :  { %1010 = vmatmul.mubr.f32.vlgmr.msra.gmra.mxu1 %v253_v32 }
 0x295   :  { %1048 = vmatpush3.msra.mxu1 %v1231_v1  ;;  %1079 = vmatprep.mubr.msk.f32.mxu1 %vm1206_vm0, %v1205_v0 }
 0x296   :  { %1049 = vmatprep.subr.mxu1 %v1205_v0 }
 0x297   :  { %1050 = vmatpush3.msra.mxu1 %v1236_v2 }
 0x298   :  { %1051 = vmatprep.subr.mxu1 %v1205_v0 }
 0x299   :  { %1052 = vmatpush3.msra.mxu1 %v1246_v3 }
 0x29a   :  { %1053 = vmatprep.subr.mxu1 %v1205_v0 }
 0x29b   :  { %1054 = vmatpush3.msra.mxu1 %v1255_v4 }
 0x29c   :  { %1055 = vmatprep.subr.mxu1 %v1205_v0 }
 0x29d   :  { %1056 = vmatpush3.msra.mxu1 %v1264_v5 }
 0x29e   :  { %1057 = vmatprep.subr.mxu1 %v1205_v0 }
 0x29f   :  { %1058 = vmatpush3.msra.mxu1 %v1273_v6 }
 0x2a0   :  { %1059 = vmatprep.subr.mxu1 %v1205_v0 }
 0x2a1   :  { %1060 = vmatpush3.msra.mxu1 %v1282_v7 }
 0x2a2   :  { %1061 = vmatprep.subr.mxu1 %v1205_v0 }
 0x2a3   :  { %1062 = vmatpush3.msra.mxu1 %v1291_v8 }
 0x2a4   :  { %1063 = vmatprep.subr.mxu1 %v1205_v0 }
 0x2a5   :  { %1064 = vmatpush3.msra.mxu1 %v1300_v9 }
 0x2a6   :  { %1065 = vmatprep.subr.mxu1 %v1205_v0 }
 0x2a7   :  { %1066 = vmatpush3.msra.mxu1 %v1309_v10 }
 0x2a8   :  { %1067 = vmatprep.subr.mxu1 %v1205_v0 }
 0x2a9   :  { %1068 = vmatpush3.msra.mxu1 %v1318_v11 }
 0x2aa   :  { %1069 = vmatprep.subr.mxu1 %v1205_v0 }
 0x2ab   :  { %1070 = vmatpush3.msra.mxu1 %v1327_v12 }
 0x2ac   :  { %1071 = vmatprep.subr.mxu1 %v1205_v0 }
 0x2ad   :  { %1072 = vmatpush3.msra.mxu1 %v1336_v13 }
 0x2ae   :  { %1073 = vmatprep.subr.mxu1 %v1205_v0 }
 0x2af   :  { %1074 = vmatpush3.msra.mxu1 %v1345_v14 }
 0x2b0   :  { %1075 = vmatprep.subr.mxu1 %v1205_v0 }
 0x2b1   :  { %1076 = vmatpush3.msra.mxu1 %v1354_v15 }
 0x2b2   :  { %1077 = vmatprep.subr.mxu1 %v1205_v0 }
 0x2b3   :  { %1078 = vmatpush3.msra.mxu1 %v1363_v16 }
 0x2b4   :  { %1117 = vmatprep.subr.mxu1 %v1205_v0 }
 0x354   :  { %v320_v33 = vpop.f32.mrf.mxu1 }
 0x355   :  { %1195 = vtanh.f32 %v320_v33 }
 0x356   :  { %v1011_v34 = vpop.f32.mrf.mxu1 }
 0x362   :  { %v1196_v36 = vpop.eup %1195 }
 0x363   :  { %v327_v37 = vadd.f32 %v1196_v36, %v715_v35 }
 0x365   :  { %1045 = vmatmul.mubr.f32.vlgmr.msra.gmra.mxu0 %v327_v37 }
 0x366   :  { %1083 = vmatpush3.msra.mxu0 %v1231_v1  ;;  %1114 = vmatprep.mubr.msk.f32.mxu0 %vm1206_vm0, %v1205_v0 }
 0x367   :  { %1084 = vmatprep.subr.mxu0 %v1205_v0 }
 0x368   :  { %1085 = vmatpush3.msra.mxu0 %v1236_v2 }
 0x369   :  { %1086 = vmatprep.subr.mxu0 %v1205_v0 }
 0x36a   :  { %1087 = vmatpush3.msra.mxu0 %v1246_v3 }
 0x36b   :  { %1088 = vmatprep.subr.mxu0 %v1205_v0 }
 0x36c   :  { %1089 = vmatpush3.msra.mxu0 %v1255_v4 }
 0x36d   :  { %1090 = vmatprep.subr.mxu0 %v1205_v0 }
 0x36e   :  { %1091 = vmatpush3.msra.mxu0 %v1264_v5 }
 0x36f   :  { %1092 = vmatprep.subr.mxu0 %v1205_v0 }
 0x370   :  { %1093 = vmatpush3.msra.mxu0 %v1273_v6 }
 0x371   :  { %1094 = vmatprep.subr.mxu0 %v1205_v0 }
 0x372   :  { %1095 = vmatpush3.msra.mxu0 %v1282_v7 }
 0x373   :  { %1096 = vmatprep.subr.mxu0 %v1205_v0 }
 0x374   :  { %1097 = vmatpush3.msra.mxu0 %v1291_v8 }
 0x375   :  { %1098 = vmatprep.subr.mxu0 %v1205_v0 }
 0x376   :  { %1099 = vmatpush3.msra.mxu0 %v1300_v9 }
 0x377   :  { %1100 = vmatprep.subr.mxu0 %v1205_v0 }
 0x378   :  { %1101 = vmatpush3.msra.mxu0 %v1309_v10 }
 0x379   :  { %1102 = vmatprep.subr.mxu0 %v1205_v0 }
 0x37a   :  { %1103 = vmatpush3.msra.mxu0 %v1318_v11 }
 0x37b   :  { %1104 = vmatprep.subr.mxu0 %v1205_v0 }
 0x37c   :  { %1105 = vmatpush3.msra.mxu0 %v1327_v12 }
 0x37d   :  { %1106 = vmatprep.subr.mxu0 %v1205_v0 }
 0x37e   :  { %1107 = vmatpush3.msra.mxu0 %v1336_v13 }
 0x37f   :  { %1108 = vmatprep.subr.mxu0 %v1205_v0 }
 0x380   :  { %1109 = vmatpush3.msra.mxu0 %v1345_v14 }
 0x381   :  { %1110 = vmatprep.subr.mxu0 %v1205_v0 }
 0x382   :  { %1111 = vmatpush3.msra.mxu0 %v1354_v15 }
 0x383   :  { %1112 = vmatprep.subr.mxu0 %v1205_v0 }
 0x384   :  { %1113 = vmatpush3.msra.mxu0 %v1363_v16 }
 0x385   :  { %1152 = vmatprep.subr.mxu0 %v1205_v0 }
 0x425   :  { %v394_v38 = vpop.f32.mrf.mxu0 }
 0x426   :  { %1197 = vtanh.f32 %v394_v38 }
 0x427   :  { %v1046_v39 = vpop.f32.mrf.mxu0 }
 0x433   :  { %v1198_v41 = vpop.eup %1197 }
 0x434   :  { %v401_v42 = vadd.f32 %v1198_v41, %v716_v40 }
 0x436   :  { %1080 = vmatmul.mubr.f32.vlgmr.msra.gmra.mxu1 %v401_v42 }
 0x437   :  { %1118 = vmatpush3.msra.mxu1 %v1231_v1  ;;  %1149 = vmatprep.mubr.msk.f32.mxu1 %vm1206_vm0, %v1205_v0  ;;  %v625_v1 = vld [vmem:[%s1674_s2 + $0x20] sm:$0xff] }
 0x438   :  { %1119 = vmatprep.subr.mxu1 %v1205_v0 }
 0x439   :  { %1120 = vmatpush3.msra.mxu1 %v1236_v2  ;;  %v624_v2 = vld [vmem:[%s1674_s2 + $0x18] sm:$0xff] }
 0x43a   :  { %1121 = vmatprep.subr.mxu1 %v1205_v0 }
 0x43b   :  { %1122 = vmatpush3.msra.mxu1 %v1246_v3  ;;  %v623_v3 = vld [vmem:[%s1674_s2 + $0x10] sm:$0xff] }
 0x43c   :  { %1123 = vmatprep.subr.mxu1 %v1205_v0 }
 0x43d   :  { %1124 = vmatpush3.msra.mxu1 %v1255_v4  ;;  %v622_v4 = vld [vmem:[%s1674_s2 + $0x8] sm:$0xff] }
 0x43e   :  { %1125 = vmatprep.subr.mxu1 %v1205_v0 }
 0x43f   :  { %1126 = vmatpush3.msra.mxu1 %v1264_v5  ;;  %v621_v5 = vld [vmem:[%s1674_s2] sm:$0xff] }
 0x440   :  { %1127 = vmatprep.subr.mxu1 %v1205_v0 }
 0x441   :  { %1128 = vmatpush3.msra.mxu1 %v1273_v6 }
 0x442   :  { %1129 = vmatprep.subr.mxu1 %v1205_v0 }
 0x443   :  { %1130 = vmatpush3.msra.mxu1 %v1282_v7 }
 0x444   :  { %1131 = vmatprep.subr.mxu1 %v1205_v0 }
 0x445   :  { %1132 = vmatpush3.msra.mxu1 %v1291_v8 }
 0x446   :  { %1133 = vmatprep.subr.mxu1 %v1205_v0 }
 0x447   :  { %1134 = vmatpush3.msra.mxu1 %v1300_v9 }
 0x448   :  { %1135 = vmatprep.subr.mxu1 %v1205_v0 }
 0x449   :  { %1136 = vmatpush3.msra.mxu1 %v1309_v10 }
 0x44a   :  { %1137 = vmatprep.subr.mxu1 %v1205_v0 }
 0x44b   :  { %1138 = vmatpush3.msra.mxu1 %v1318_v11 }
 0x44c   :  { %1139 = vmatprep.subr.mxu1 %v1205_v0 }
 0x44d   :  { %1140 = vmatpush3.msra.mxu1 %v1327_v12 }
 0x44e   :  { %1141 = vmatprep.subr.mxu1 %v1205_v0 }
 0x44f   :  { %1142 = vmatpush3.msra.mxu1 %v1336_v13 }
 0x450   :  { %1143 = vmatprep.subr.mxu1 %v1205_v0 }
 0x451   :  { %1144 = vmatpush3.msra.mxu1 %v1345_v14 }
 0x452   :  { %1145 = vmatprep.subr.mxu1 %v1205_v0 }
 0x453   :  { %1146 = vmatpush3.msra.mxu1 %v1354_v15 }
 0x454   :  { %1147 = vmatprep.subr.mxu1 %v1205_v0 }
 0x455   :  { %1148 = vmatpush3.msra.mxu1 %v1363_v16 }
 0x4f6   :  { %v468_v43 = vpop.f32.mrf.mxu1 }
 0x4f7   :  { %1199 = vtanh.f32 %v468_v43 }
 0x4f8   :  { %v1081_v44 = vpop.f32.mrf.mxu1 }
 0x504   :  { %v1200_v46 = vpop.eup %1199 }
 0x505   :  { %v475_v47 = vadd.f32 %v1200_v46, %v717_v45 }
 0x507   :  { %1115 = vmatmul.mubr.f32.vlgmr.msra.gmra.mxu0 %v475_v47 }
 0x508   :  { %1184 = vmatprep.mubr.msk.f32.mxu0 %vm1206_vm0, %v1205_v0  ;;  %1153 = vmatpush3.msra.mxu0 %v636_v48 }
 0x509   :  { %1154 = vmatprep.subr.mxu0 %v1205_v0 }
 0x50a   :  { %1155 = vmatpush3.msra.mxu0 %v635_v49 }
 0x50b   :  { %1156 = vmatprep.subr.mxu0 %v1205_v0 }
 0x50c   :  { %1157 = vmatpush3.msra.mxu0 %v634_v50 }
 0x50d   :  { %1158 = vmatprep.subr.mxu0 %v1205_v0 }
 0x50e   :  { %1159 = vmatpush3.msra.mxu0 %v633_v51 }
 0x50f   :  { %1160 = vmatprep.subr.mxu0 %v1205_v0 }
 0x510   :  { %1161 = vmatpush3.msra.mxu0 %v632_v52 }
 0x511   :  { %1162 = vmatprep.subr.mxu0 %v1205_v0 }
 0x512   :  { %1163 = vmatpush3.msra.mxu0 %v631_v53 }
 0x513   :  { %1164 = vmatprep.subr.mxu0 %v1205_v0 }
 0x514   :  { %1165 = vmatpush3.msra.mxu0 %v630_v54 }
 0x515   :  { %1166 = vmatprep.subr.mxu0 %v1205_v0 }
 0x516   :  { %1167 = vmatpush3.msra.mxu0 %v629_v55 }
 0x517   :  { %1168 = vmatprep.subr.mxu0 %v1205_v0 }
 0x518   :  { %1169 = vmatpush3.msra.mxu0 %v628_v61 }
 0x519   :  { %1170 = vmatprep.subr.mxu0 %v1205_v0 }
 0x51a   :  { %1171 = vmatpush3.msra.mxu0 %v627_v62 }
 0x51b   :  { %1172 = vmatprep.subr.mxu0 %v1205_v0 }
 0x51c   :  { %1173 = vmatpush3.msra.mxu0 %v626_v63 }
 0x51d   :  { %1174 = vmatprep.subr.mxu0 %v1205_v0 }
 0x51e   :  { %1175 = vmatpush3.msra.mxu0 %v625_v1 }
 0x51f   :  { %1176 = vmatprep.subr.mxu0 %v1205_v0 }
 0x520   :  { %1177 = vmatpush3.msra.mxu0 %v624_v2 }
 0x521   :  { %1178 = vmatprep.subr.mxu0 %v1205_v0 }
 0x522   :  { %1179 = vmatpush3.msra.mxu0 %v623_v3 }
 0x523   :  { %1180 = vmatprep.subr.mxu0 %v1205_v0 }
 0x524   :  { %1181 = vmatpush3.msra.mxu0 %v622_v4 }
 0x525   :  { %1182 = vmatprep.subr.mxu0 %v1205_v0 }
 0x526   :  { %1183 = vmatpush3.msra.mxu0 %v621_v5 }
 0x5c7   :  { %v542_v56 = vpop.f32.mrf.mxu0 }
 0x5c8   :  { %1201 = vtanh.f32 %v542_v56 }
 0x5c9   :  { %v1116_v57 = vpop.f32.mrf.mxu0 }
 0x5d5   :  { %v1202_v59 = vpop.eup %1201 }
 0x5d6   :  { %v549_v60 = vadd.f32 %v1202_v59, %v718_v58 }
 0x5d8   :  { %1150 = vmatmul.mubr.f32.vlgmr.msra.gmra.mxu1 %v549_v60 }
 0x698   :  { %v616_v6 = vpop.f32.mrf.mxu1 }
 0x699   :  { %1203 = vtanh.f32 %v616_v6 }
 0x69a   :  { %v1151_v7 = vpop.f32.mrf.mxu1 }
 0x6a6   :  { %v1204_v8 = vpop.eup %1203 }
 0x6a7   :  { %1185 = vmatmul.mubr.f32.vlgmr.msra.gmra.mxu0 %v1204_v8 }
 0x767   :  { %v703_v9 = vpop.f32.mrf.mxu0 }
 0x768   :  { %707 = vst [vmem:[%s1675_s3] sm:$0xff] %v703_v9 }
 0x769   :  { %v1186_v10 = vpop.f32.mrf.mxu0 }

</bundles_post_ra>
